<compile_context>
chip_gen: v7x
topology: tpu7x:2x2x1
jax: 0.10.0
libtpu: 0.0.40
codegen_flags: <defaults>
</compile_context>

<pallas_src>
import jax
import jax.numpy as jnp
from jax.experimental import pallas as pl
from jax.experimental.pallas import tpu as pltpu


# ----------------------------------------------------------------------------
# Fused kernel: channel attention -> out1 -> channel max/mean -> 7x7 conv
# (as one matmul) -> sigmoid -> out1 * sa + residual, all in VMEM.
# ----------------------------------------------------------------------------
def cbam_kernel(x_ref, w1_ref, w2_ref, m_ref, b_ref, o_ref):
    """Fused CBAM forward for a block of Bt images.

    x_ref : (Bt, C, HW)   activations (caller dtype)          VMEM
    w1_ref: (Cr, C)       SE squeeze weight, bf16             VMEM (constant)
    w2_ref: (C, Cr)       SE excite weight, bf16              VMEM (constant)
    m_ref : (2*HW, HW)    baked 7x7 'same' conv matrix, bf16  VMEM (constant)
    b_ref : (1,)          conv bias, f32                      SMEM
    o_ref : (Bt, C, HW)   output (caller dtype)               VMEM
    """
    bt, c, hw = x_ref.shape
    inv_hw = 1.0 / hw
    inv_c = 1.0 / c

    # Load per-image (C, HW) slabs once; element-wise math stays f32.
    xs = [x_ref[b].astype(jnp.float32) for b in range(bt)]

    # --- Channel attention pools: lane reductions -> pooled (C, 2*Bt) -------
    cols = [jnp.max(xs[b], axis=1, keepdims=True) for b in range(bt)]             # max
    cols += [jnp.sum(xs[b], axis=1, keepdims=True) * inv_hw for b in range(bt)]   # avg
    pooled = jnp.concatenate(cols, axis=1)                                        # (C, 2*Bt)

    # --- Shared SE MLP on both pooled vectors (bf16 MXU, f32 accumulate) ----
    h1 = jnp.maximum(
        jnp.dot(w1_ref[...], pooled.astype(jnp.bfloat16),
                preferred_element_type=jnp.float32), 0.0)                         # (Cr, 2*Bt)
    se = jnp.dot(w2_ref[...], h1.astype(jnp.bfloat16),
                 preferred_element_type=jnp.float32)                              # (C, 2*Bt)

    # --- Per-image: CA scale, then channel max/mean for spatial attention ---
    out1s = []
    rows = []
    for b in range(bt):
        ca = jax.nn.sigmoid(se[:, b:b + 1] + se[:, bt + b:bt + b + 1])            # (C, 1)
        out1 = xs[b] * ca                                                         # (C, HW)
        out1s.append(out1)
        spmax = jnp.max(out1, axis=0, keepdims=True)                              # (1, HW)
        spavg = jnp.sum(out1, axis=0, keepdims=True) * inv_c                      # (1, HW)
        rows.append(jnp.concatenate([spmax, spavg], axis=1))                      # (1, 2*HW)
    sp = jnp.concatenate(rows, axis=0)                                            # (Bt, 2*HW)

    # --- 7x7 'same' conv as ONE fused MXU matmul against the baked matrix ---
    logit = jnp.dot(sp.astype(jnp.bfloat16), m_ref[...],
                    preferred_element_type=jnp.float32) + b_ref[0]                # (Bt, HW)
    sa = jax.nn.sigmoid(logit)

    # --- out = out1 * sa + residual ------------------------------------------
    for b in range(bt):
        o_ref[b] = (out1s[b] * sa[b:b + 1, :] + xs[b]).astype(o_ref.dtype)


# ----------------------------------------------------------------------------
# Wrapper-side constant construction (runs ONCE, outside the per-call path)
# ----------------------------------------------------------------------------
def _build_conv_matrix(sa_w, H, W):
    """Bake Conv2d(2, 1, K, padding=K//2) into a dense (2*HW, HW) matrix.

    M[c*HW + i, j] = contribution of input pixel i (= hi*W + wi) of channel c
    to output pixel j (= ho*W + wo), with 'same' zero padding baked in.
    """
    K = sa_w.shape[-1]
    P = K // 2
    HW = H * W
    dh = jnp.arange(H)[:, None] - jnp.arange(H)[None, :] + P      # (Hi, Ho)
    dw = jnp.arange(W)[:, None] - jnp.arange(W)[None, :] + P      # (Wi, Wo)
    vh = (dh >= 0) & (dh < K)
    vw = (dw >= 0) & (dw < K)
    dh_c = jnp.clip(dh, 0, K - 1)
    dw_c = jnp.clip(dw, 0, K - 1)
    m4 = sa_w[:, dh_c[:, None, :, None], dw_c[None, :, None, :]]  # (2,Hi,Wi,Ho,Wo)
    valid = (vh[:, None, :, None] & vw[None, :, None, :])[None]
    m = jnp.where(valid, m4, 0.0).reshape(2, HW, HW)
    return m.reshape(2 * HW, HW)


def _pick_batch_block(B):
    """Images per grid step: amortize the ~0.35 us per-step overhead, but keep
    the grid length >= 2 so both v7x TensorCores get work ("parallel" axis)."""
    for bt in (8, 4, 2):
        if B % bt == 0 and B // bt >= 2:
            return bt
    return 1


def make_cbam_forward(w1, w2, sa_w, sa_b, H, W):
    """Precompute per-parameter constants once; return a jitted forward(x).

    w1: (C//r, C)   Conv2d(C, C//r, 1, bias=False) weight
    w2: (C, C//r)   Conv2d(C//r, C, 1, bias=False) weight
    sa_w: (2, K, K), sa_b: (1,)   Conv2d(2, 1, K, padding=K//2) weight / bias
    """
    Cr, C = w1.shape
    HW = H * W

    # Built once per (params, H, W): bf16 MXU operands, f32 scalar bias.
    m2 = _build_conv_matrix(jnp.asarray(sa_w, jnp.float32), H, W).astype(jnp.bfloat16)
    w1b = jnp.asarray(w1, jnp.bfloat16)
    w2b = jnp.asarray(w2, jnp.bfloat16)
    bias = jnp.asarray(sa_b, jnp.float32).reshape(1)

    m_bytes = int(m2.size) * 2  # bf16
    # TODO(synk): tiled / per-kh banded conv path before the dense O(HW^2)
    # matrix stops fitting VMEM (v7x has only 64 MiB total).
    assert 2 * m_bytes <= (48 << 20), (
        f"dense conv-matrix spatial attention too large for VMEM at H*W={HW}; "
        "switch to a tiled/banded conv formulation")
    # NOTE: HW should be a multiple of 128 for lane-dense tiles (16x16 -> 256
    # already is).  TODO(synk): pad HW (with masked max-pool) for e.g. 14x14.

    @jax.jit
    def forward(x):
        B, xc, xh, xw = x.shape
        assert xc == C and xh == H and xw == W
        Bt = _pick_batch_block(B)
        xs = x.reshape(B, C, HW)   # free view: C on sublanes, HW on lanes

        x_blk = Bt * C * HW * x.dtype.itemsize
        # in+out blocks double-buffered + constants double-buffered + slack.
        vmem_need = 4 * x_blk + 2 * m_bytes + 4 * (int(w1b.size) + int(w2b.size)) + (2 << 20)
        vmem_limit = int(min(max(32 << 20, vmem_need), 96 << 20))

        out = pl.pallas_call(
            cbam_kernel,
            out_shape=jax.ShapeDtypeStruct((B, C, HW), xs.dtype),
            grid_spec=pltpu.PrefetchScalarGridSpec(
                num_scalar_prefetch=0,
                grid=(B // Bt,),
                in_specs=[
                    pl.BlockSpec((Bt, C, HW), lambda i: (i, 0, 0)),     # x (Bt images)
                    pl.BlockSpec((Cr, C), lambda i: (0, 0)),            # w1 (constant)
                    pl.BlockSpec((C, Cr), lambda i: (0, 0)),            # w2 (constant)
                    pl.BlockSpec((2 * HW, HW), lambda i: (0, 0)),       # conv matrix (constant)
                    pl.BlockSpec(memory_space=pltpu.MemorySpace.SMEM),  # conv bias
                ],
                out_specs=pl.BlockSpec((Bt, C, HW), lambda i: (i, 0, 0)),
            ),
            compiler_params=pltpu.CompilerParams(
                dimension_semantics=("parallel",),
                vmem_limit_bytes=vmem_limit,
            ),
        )(xs, w1b, w2b, m2, bias)
        return out.reshape(B, C, H, W)

    return forward


# ----------------------------------------------------------------------------
# Pure-JAX f32 reference (same semantics as the PyTorch module)
# ----------------------------------------------------------------------------
def cbam_ref(x, w1, w2, sa_w, sa_b):
    P = sa_w.shape[-1] // 2
    maxp = jnp.max(x, axis=(2, 3))
    avgp = jnp.mean(x, axis=(2, 3))

    def se(v):
        return jnp.maximum(v @ w1.T, 0.0) @ w2.T

    ca = jax.nn.sigmoid(se(maxp) + se(avgp))[:, :, None, None]
    out1 = x * ca
    sp = jnp.stack([jnp.max(out1, axis=1), jnp.mean(out1, axis=1)], axis=1)
    conv = jax.lax.conv_general_dilated(
        sp, sa_w[None], window_strides=(1, 1), padding=((P, P), (P, P)),
        dimension_numbers=("NCHW", "OIHW", "NCHW"),
        precision=jax.lax.Precision.HIGHEST)
    sa = jax.nn.sigmoid(conv + sa_b.reshape(1, 1, 1, 1))
    return out1 * sa + x


if __name__ == "__main__":
    B, C, H, W = 2, 64, 16, 16
    reduction, K = 16, 7
    Cr = C // reduction

    key = jax.random.PRNGKey(0)
    kx, k1, k2, k3, k4 = jax.random.split(key, 5)

    x = jax.random.normal(kx, (B, C, H, W), jnp.float32)
    # Deterministic synthetic parameters (kaiming-ish scaling).
    w1 = jax.random.normal(k1, (Cr, C), jnp.float32) * (2.0 / C) ** 0.5   # Conv2d(C, C//r, 1)
    w2 = jax.random.normal(k2, (C, Cr), jnp.float32) * (2.0 / Cr) ** 0.5  # Conv2d(C//r, C, 1)
    sa_w = jax.random.normal(k3, (2, K, K), jnp.float32) * 0.1            # Conv2d(2, 1, 7) weight
    sa_b = jax.random.normal(k4, (1,), jnp.float32) * 0.1                 # Conv2d(2, 1, 7) bias

    # Constants (conv matrix, bf16 weights) are built exactly once here.
    cbam_forward = make_cbam_forward(w1, w2, sa_w, sa_b, H, W)

    out = jax.block_until_ready(cbam_forward(x))

    ref = cbam_ref(x, w1, w2, sa_w, sa_b)
    assert out.shape == (B, C, H, W)
    max_err = float(jnp.max(jnp.abs(out - ref)))
    # bf16 MXU operands with f32 accumulation vs. an all-f32 reference.
    assert jnp.allclose(out, ref, atol=3e-2, rtol=3e-2), max_err
    print("KERNEL_OK")
</pallas_src>

<mosaic_0001>
module attributes {stable_mosaic.version = 11 : i64} {
  func.func @cbam_kernel(%arg0: i32, %arg1: memref<1x64x256xf32, #tpu.memory_space<vmem>>, %arg2: memref<4x64xbf16, #tpu.memory_space<vmem>>, %arg3: memref<64x4xbf16, #tpu.memory_space<vmem>>, %arg4: memref<512x256xbf16, #tpu.memory_space<vmem>>, %arg5: memref<1xf32, #tpu.memory_space<smem>>, %arg6: memref<1x64x256xf32, #tpu.memory_space<vmem>>) attributes {dimension_semantics = [#tpu.dimension_semantics<parallel>], iteration_bounds = array<i64: 2>, scalar_prefetch = 0 : i64, scratch_operands = 0 : i64, tpu.core_type = #tpu.core_type<tc>, window_params = [{transform_indices = @transform_0, window_bounds = array<i64: 1, 64, 256>}, {pipeline_mode = #tpu.pipeline_mode<synchronous>, transform_indices = @transform_1, window_bounds = array<i64: 4, 64>}, {pipeline_mode = #tpu.pipeline_mode<synchronous>, transform_indices = @transform_2, window_bounds = array<i64: 64, 4>}, {pipeline_mode = #tpu.pipeline_mode<synchronous>, transform_indices = @transform_3, window_bounds = array<i64: 512, 256>}, {transform_indices = @transform_4, window_bounds = array<i64: 1>}, {transform_indices = @transform_5, window_bounds = array<i64: 1, 64, 256>}]} {
    %c0 = arith.constant 0 : index
    %c0_0 = arith.constant 0 : index
    %c0_1 = arith.constant 0 : index
    %0 = vector.load %arg1[%c0, %c0_0, %c0_1] : memref<1x64x256xf32, #tpu.memory_space<vmem>>, vector<1x64x256xf32>
    %1 = vector.shape_cast %0 : vector<1x64x256xf32> to vector<64x256xf32>
    %cst = arith.constant dense<0xFF800000> : vector<64xf32>
    %2 = vector.multi_reduction <maximumf>, %1, %cst [1] : vector<64x256xf32> to vector<64xf32>
    %3 = vector.shape_cast %2 : vector<64xf32> to vector<64x1xf32>
    %cst_2 = arith.constant dense<0.000000e+00> : vector<64xf32>
    %4 = vector.multi_reduction <add>, %1, %cst_2 [1] : vector<64x256xf32> to vector<64xf32>
    %5 = vector.shape_cast %4 : vector<64xf32> to vector<64x1xf32>
    %cst_3 = arith.constant 3.906250e-03 : f32
    %6 = vector.broadcast %cst_3 : f32 to vector<64x1xf32>
    %7 = arith.mulf %5, %6 : vector<64x1xf32>
    %8 = tpu.concatenate %3, %7 in 1 : vector<64x1xf32>, vector<64x1xf32> -> vector<64x2xf32>
    %c0_4 = arith.constant 0 : index
    %c0_5 = arith.constant 0 : index
    %9 = vector.load %arg2[%c0_4, %c0_5] : memref<4x64xbf16, #tpu.memory_space<vmem>>, vector<4x64xbf16>
    %10 = arith.truncf %8 : vector<64x2xf32> to vector<64x2xbf16>
    %cst_6 = arith.constant dense<0.000000e+00> : vector<4x2xf32>
    %11 = tpu.matmul %9, %10, %cst_6 {dimension_numbers = #tpu.dot_dimension_numbers<[1], [0], [0], [1], [0, 0, 1, 1], [], []>} : vector<4x64xbf16>, vector<64x2xbf16>, vector<4x2xf32> -> vector<4x2xf32>
    %cst_7 = arith.constant 0.000000e+00 : f32
    %12 = vector.broadcast %cst_7 : f32 to vector<4x2xf32>
    %13 = arith.maximumf %11, %12 : vector<4x2xf32>
    %c0_8 = arith.constant 0 : index
    %c0_9 = arith.constant 0 : index
    %14 = vector.load %arg3[%c0_8, %c0_9] : memref<64x4xbf16, #tpu.memory_space<vmem>>, vector<64x4xbf16>
    %15 = arith.truncf %13 : vector<4x2xf32> to vector<4x2xbf16>
    %cst_10 = arith.constant dense<0.000000e+00> : vector<64x2xf32>
    %16 = tpu.matmul %14, %15, %cst_10 {dimension_numbers = #tpu.dot_dimension_numbers<[1], [0], [0], [1], [0, 0, 1, 1], [], []>} : vector<64x4xbf16>, vector<4x2xbf16>, vector<64x2xf32> -> vector<64x2xf32>
    %17 = vector.extract_strided_slice %16 {offsets = [0, 0], sizes = [64, 1], strides = [1, 1]} : vector<64x2xf32> to vector<64x1xf32>
    %18 = vector.extract_strided_slice %16 {offsets = [0, 1], sizes = [64, 1], strides = [1, 1]} : vector<64x2xf32> to vector<64x1xf32>
    %19 = arith.addf %17, %18 : vector<64x1xf32>
    %20 = arith.negf %19 : vector<64x1xf32>
    %21 = math.exp %20 : vector<64x1xf32>
    %cst_11 = arith.constant 1.000000e+00 : f32
    %22 = vector.broadcast %cst_11 : f32 to vector<64x1xf32>
    %23 = arith.addf %22, %21 : vector<64x1xf32>
    %24 = arith.divf %22, %23 : vector<64x1xf32>
    %25 = vector.broadcast %24 : vector<64x1xf32> to vector<64x256xf32>
    %26 = arith.mulf %1, %25 : vector<64x256xf32>
    %cst_12 = arith.constant dense<0xFF800000> : vector<256xf32>
    %27 = vector.multi_reduction <maximumf>, %26, %cst_12 [0] : vector<64x256xf32> to vector<256xf32>
    %28 = vector.shape_cast %27 : vector<256xf32> to vector<1x256xf32>
    %cst_13 = arith.constant dense<0.000000e+00> : vector<256xf32>
    %29 = vector.multi_reduction <add>, %26, %cst_13 [0] : vector<64x256xf32> to vector<256xf32>
    %30 = vector.shape_cast %29 : vector<256xf32> to vector<1x256xf32>
    %cst_14 = arith.constant 1.562500e-02 : f32
    %31 = vector.broadcast %cst_14 : f32 to vector<1x256xf32>
    %32 = arith.mulf %30, %31 : vector<1x256xf32>
    %33 = tpu.concatenate %28, %32 in 1 : vector<1x256xf32>, vector<1x256xf32> -> vector<1x512xf32>
    %34 = arith.truncf %33 : vector<1x512xf32> to vector<1x512xbf16>
    %c0_15 = arith.constant 0 : index
    %c0_16 = arith.constant 0 : index
    %35 = vector.load %arg4[%c0_15, %c0_16] : memref<512x256xbf16, #tpu.memory_space<vmem>>, vector<512x256xbf16>
    %cst_17 = arith.constant dense<0.000000e+00> : vector<1x256xf32>
    %36 = tpu.matmul %34, %35, %cst_17 {dimension_numbers = #tpu.dot_dimension_numbers<[1], [0], [0], [1], [0, 0, 1, 1], [], []>} : vector<1x512xbf16>, vector<512x256xbf16>, vector<1x256xf32> -> vector<1x256xf32>
    %c0_18 = arith.constant 0 : index
    %37 = memref.load %arg5[%c0_18] : memref<1xf32, #tpu.memory_space<smem>>
    %38 = vector.broadcast %37 : f32 to vector<1x256xf32>
    %39 = arith.addf %36, %38 : vector<1x256xf32>
    %40 = arith.negf %39 : vector<1x256xf32>
    %41 = math.exp %40 : vector<1x256xf32>
    %cst_19 = arith.constant 1.000000e+00 : f32
    %42 = vector.broadcast %cst_19 : f32 to vector<1x256xf32>
    %43 = arith.addf %42, %41 : vector<1x256xf32>
    %44 = arith.divf %42, %43 : vector<1x256xf32>
    %45 = vector.broadcast %44 : vector<1x256xf32> to vector<64x256xf32>
    %46 = arith.mulf %26, %45 : vector<64x256xf32>
    %47 = arith.addf %46, %1 : vector<64x256xf32>
    %c0_20 = arith.constant 0 : index
    %c0_21 = arith.constant 0 : index
    %c0_22 = arith.constant 0 : index
    %48 = vector.load %arg6[%c0_20, %c0_21, %c0_22] : memref<1x64x256xf32, #tpu.memory_space<vmem>>, vector<1x64x256xf32>
    %49 = vector.shape_cast %48 : vector<1x64x256xf32> to vector<64x256xf32>
    %50 = vector.shape_cast %47 : vector<64x256xf32> to vector<1x64x256xf32>
    tpu.vector_store %arg6[%c0_20, %c0_21, %c0_22], %50 {strides = array<i32>} : memref<1x64x256xf32, #tpu.memory_space<vmem>>, vector<1x64x256xf32>,
    return
  }
  func.func @transform_0(%arg0: i32) -> (i32, i32, i32) {
    %c0_i32 = arith.constant 0 : i32
    %c0_i32_0 = arith.constant 0 : i32
    %c0_i32_1 = arith.constant 0 : i32
    return %arg0, %c0_i32, %c0_i32_0 : i32, i32, i32
  }
  func.func @transform_1(%arg0: i32) -> (i32, i32) {
    %c0_i32 = arith.constant 0 : i32
    %c0_i32_0 = arith.constant 0 : i32
    %c0_i32_1 = arith.constant 0 : i32
    return %c0_i32, %c0_i32_0 : i32, i32
  }
  func.func @transform_2(%arg0: i32) -> (i32, i32) {
    %c0_i32 = arith.constant 0 : i32
    %c0_i32_0 = arith.constant 0 : i32
    %c0_i32_1 = arith.constant 0 : i32
    return %c0_i32, %c0_i32_0 : i32, i32
  }
  func.func @transform_3(%arg0: i32) -> (i32, i32) {
    %c0_i32 = arith.constant 0 : i32
    %c0_i32_0 = arith.constant 0 : i32
    %c0_i32_1 = arith.constant 0 : i32
    return %c0_i32, %c0_i32_0 : i32, i32
  }
  func.func @transform_4(%arg0: i32) -> i32 {
    %c0_i32 = arith.constant 0 : i32
    %c0_i32_0 = arith.constant 0 : i32
    return %c0_i32 : i32
  }
  func.func @transform_5(%arg0: i32) -> (i32, i32, i32) {
    %c0_i32 = arith.constant 0 : i32
    %c0_i32_0 = arith.constant 0 : i32
    %c0_i32_1 = arith.constant 0 : i32
    return %arg0, %c0_i32, %c0_i32_0 : i32, i32, i32
  }
}

</mosaic_0001>

<bundles_post_ra>
// kernel: forward.1
= control target key start
LH: loop header
LB: loop body
LE: loop exit
PB: predicated region body
PF: predicated region fallthrough
CT: control target
= control target key end

     0   :  { %s1602_s20 = smov 0   ;;  %s2089_s0 = inlined_call_operand.vmem [shape: f32[2,64,256], index: 0, kind: input, shape index: {}]   ;;  %s2090_s1 = inlined_call_operand.vmem [shape: bf16[4,64], index: 1, kind: input, shape index: {}]   ;;  %s2091_s2 = inlined_call_operand.vmem [shape: bf16[64,4], index: 2, kind: input, shape index: {}]   ;;  %s2092_s3 = inlined_call_operand.vmem [shape: bf16[512,256], index: 3, kind: input, shape index: {}]   ;;  %s2093_s4 = inlined_call_operand.<no memory space> [shape: f32[1], index: 4, kind: input, shape index: {}]   ;;  %s2094_s5 = inlined_call_operand.vmem [shape: f32[2,64,256], index: 5, kind: output, shape index: {}]  }
   0x1   :  { %10 = sst [smem:[#allocation2]] %s2093_s4 }
   0x2 LB: > { %s1262_s21 = sadd.s32 4294967295, %s1563_s20   ;;  %p1266_p0 = scmp.ge.s32.totalorder %s1563_s20, 1  ;;  %s1563_s20 = sphi %s1602_s20, %s16_s20  }
   0x3   : > { %p188_p1 = scmp.lt.s32.totalorder %s1563_s20, 3 }
   0x5   : > { %p189_p2 = pnand %p1266_p0, %p188_p1 }
   0x6   : > { %p216_p3 = scmp.lt.s32.totalorder (!%p189_p2), %s1262_s21, 1  ;;  %v1565_v30 = vmov (!%p189_p2), 0.0   ;;  %vm1566_vm0 = vmmov (!%p189_p2), 0   ;;  %vm299_vm1 = vcmask (!%p189_p2), 7168   ;;  %vm313_vm2 = vcmask (!%p189_p2), 523264   ;;  %s1567_s10 = smov (!%p189_p2), 127  }
   0x7   : > { %192 = sbr.rel (%p189_p2) target bundleno = 1194 (0x4aa), region = 40  ;;  %1368 = vmatprep.subr.bf16.mxu0 (!%p189_p2), %v1565_v30  ;;  %1376 = vmatprep.mubr.msk.bf16.mxu0 (!%p189_p2), %vm1566_vm0, %v1565_v30  ;;  %vm387_vm3 = vcmask (!%p189_p2), 31744   ;;  %vm400_vm4 = vcmask (!%p189_p2), 1041408   ;;  %s735_s7 = sld [smem:[#allocation2]] (!%p189_p2) }
   0xe   : > { %s2096_s21 = smov (!%p216_p3, %s1262_s21), 1 }
   0xf   : > { %s1356_s4 = sshll.u32 %s2096_s21, 7 }
  0x10   : > { %s1618_s24 = scalar_lea.vmem %s2089_s0, %s1356_s4 }
  0x11   : > { %v1621_v0 = vld [vmem:[%s1618_s24] sm:$0xff]  ;;  %v1624_v1 = vld [vmem:[%s1618_s24 + $0x8] sm:$0xff]  ;;  %v1627_v2 = vld [vmem:[%s1618_s24 + $0x10] sm:$0xff] }
  0x12   : > { %v267_v3 = vadd.f32 %v1624_v1, %v1621_v0  ;;  %v243_v4 = vmax.f32 %v1621_v0, %v1624_v1  ;;  %v1634_v5 = vld [vmem:[%s1618_s24 + $0x18] sm:$0xff]  ;;  %v1641_v8 = vld [vmem:[%s1618_s24 + $0x20] sm:$0xff]  ;;  %v1644_v9 = vld [vmem:[%s1618_s24 + $0x28] sm:$0xff] }
  0x13   : > { %v270_v6 = vadd.f32 %v1634_v5, %v1627_v2  ;;  %v246_v7 = vmax.f32 %v1627_v2, %v1634_v5  ;;  %v1647_v10 = vld [vmem:[%s1618_s24 + $0x30] sm:$0xff]  ;;  %v1650_v11 = vld [vmem:[%s1618_s24 + $0x38] sm:$0xff]  ;;  %v273_v12 = vadd.f32 %v1644_v9, %v1641_v8  ;;  %v1657_v14 = vld [vmem:[%s1618_s24 + $0x40] sm:$0xff]  ;;  %v249_v18 = vmax.f32 %v1641_v8, %v1644_v9 }
  0x14   : > { %268 = vadd.xlane.f32.xlu0 %v267_v3  ;;  %244 = vmax.xlane.f32.xlu1 %v243_v4  ;;  %v276_v13 = vadd.f32 %v1650_v11, %v1647_v10  ;;  %v1660_v15 = vld [vmem:[%s1618_s24 + $0x48] sm:$0xff]  ;;  %v1663_v16 = vld [vmem:[%s1618_s24 + $0x50] sm:$0xff]  ;;  %v1666_v17 = vld [vmem:[%s1618_s24 + $0x58] sm:$0xff]  ;;  %v252_v19 = vmax.f32 %v1647_v10, %v1650_v11 }
  0x15   : > { %v279_v20 = vadd.f32 %v1660_v15, %v1657_v14  ;;  %v282_v21 = vadd.f32 %v1666_v17, %v1663_v16  ;;  %v1677_v22 = vld [vmem:[%s1618_s24 + $0x60] sm:$0xff]  ;;  %v1680_v23 = vld [vmem:[%s1618_s24 + $0x68] sm:$0xff]  ;;  %v1683_v24 = vld [vmem:[%s1618_s24 + $0x70] sm:$0xff]  ;;  %v255_v26 = vmax.f32 %v1657_v14, %v1660_v15  ;;  %v258_v27 = vmax.f32 %v1663_v16, %v1666_v17 }
  0x16   : > { %v1686_v25 = vld [vmem:[%s1618_s24 + $0x78] sm:$0xff]  ;;  %v285_v28 = vadd.f32 %v1680_v23, %v1677_v22  ;;  %v261_v31 = vmax.f32 %v1677_v22, %v1680_v23 }
  0x17   : > { %v288_v29 = vadd.f32 %v1686_v25, %v1683_v24  ;;  %v264_v32 = vmax.f32 %v1683_v24, %v1686_v25 }
  0x18   : > { %271 = vadd.xlane.f32.xlu0 %v270_v6  ;;  %247 = vmax.xlane.f32.xlu1 %v246_v7 }
  0x1c   : > { %274 = vadd.xlane.f32.xlu0 %v273_v12  ;;  %277 = vadd.xlane.f32.xlu1 %v276_v13  ;;  %v308_v13 = vld [vmem:[%s2090_s1] sm:$0x3] }
  0x20   : > { %250 = vmax.xlane.f32.xlu0 %v249_v18  ;;  %253 = vmax.xlane.f32.xlu1 %v252_v19  ;;  %v1409_v18 = vld [vmem:[%s2091_s2] sm:$0xff]  }
  0x21   : > { %1382 = vmatprep.mubr.msk.bf16.mxu1 %vm387_vm3, %v1409_v18 }
  0x24   : > { %280 = vadd.xlane.f32.xlu0 %v279_v20  ;;  %283 = vadd.xlane.f32.xlu1 %v282_v21 }
  0x28   : > { %256 = vmax.xlane.f32.xlu0 %v255_v26  ;;  %259 = vmax.xlane.f32.xlu1 %v258_v27 }
  0x2c   : > { %286 = vadd.xlane.f32.xlu0 %v285_v28  ;;  %289 = vadd.xlane.f32.xlu1 %v288_v29 }
  0x30   : > { %262 = vmax.xlane.f32.xlu0 %v261_v31  ;;  %265 = vmax.xlane.f32.xlu1 %v264_v32  ;;  %v1411_v31 = vld [vmem:[%s2091_s2 + $0x10] sm:$0xff]   ;;  %v1412_v32 = vld [vmem:[%s2091_s2 + $0x18] sm:$0xff]  }
  0xa1   : > { %v269_v33 = vpop.xlane.xlu0 %268  ;;  %v245_v34 = vpop.xlane.xlu1 %244 }
  0xa2   : > { %v291_v35 = vmul.f32 0.00390625, %v269_v33 }
  0xa4   : > { %v300_v39 = vsel %vm299_vm1, %v245_v34, %v291_v35 }
  0xa5   : > { %v272_v36 = vpop.xlane.xlu0 %271  ;;  %v248_v37 = vpop.xlane.xlu1 %247 }
  0xa6   : > { %v292_v38 = vmul.f32 0.00390625, %v272_v36 }
  0xa8   : > { %v301_v40 = vsel %vm299_vm1, %v248_v37, %v292_v38 }
  0xa9   : > { %v275_v41 = vpop.xlane.xlu0 %274  ;;  %v278_v42 = vpop.xlane.xlu1 %277  ;;  %v309_v43 = vpack.c.bf16 %v301_v40, %v300_v39 }
  0xaa   : > { %v293_v44 = vmul.f32 0.00390625, %v275_v41  ;;  %v294_v45 = vmul.f32 0.00390625, %v278_v42  ;;  %v1568_v41 = vmov 0   ;;  %v1413_v42 = vld [vmem:[%s2092_s3] ss:$8 sps:$4 sm:$0xff]  }
  0xab   : > { %1369 = vmatpush3.bf16.msra.mxu0 %v309_v43  ;;  %1407 = vset.pattern.permute.xlu0 %v1568_v41  ;;  %v1415_v43 = vld [vmem:[%s2092_s3 + $0x4] ss:$8 sps:$4 sm:$0xff]  }
  0xac   : > { %1370 = vmatprep.subr.bf16.mxu0 %v1565_v30  ;;  %1408 = vset.pattern.permute.xlu1 %v1568_v41 }
  0xad   : > { %v251_v46 = vpop.xlane.xlu0 %250  ;;  %v254_v47 = vpop.xlane.xlu1 %253 }
  0xae   : > { %v302_v48 = vsel %vm299_vm1, %v251_v46, %v293_v44  ;;  %v303_v49 = vsel %vm299_vm1, %v254_v47, %v294_v45  ;;  %v1416_v44 = vld [vmem:[%s2092_s3 + $0x100] ss:$8 sps:$4 sm:$0xff]   ;;  %v1418_v45 = vld [vmem:[%s2092_s3 + $0x104] ss:$8 sps:$4 sm:$0xff]   ;;  %v1421_v46 = vld [vmem:[%s2092_s3 + $0x14] ss:$8 sps:$4 sm:$0xff]  }
  0xaf   : > { %v310_v50 = vpack.c.bf16 %v303_v49, %v302_v48  ;;  %v1424_v47 = vld [vmem:[%s2092_s3 + $0x114] ss:$8 sps:$4 sm:$0xff]   ;;  %v1419_v48 = vld [vmem:[%s2092_s3 + $0x10] ss:$8 sps:$4 sm:$0xff]  }
  0xb0   : > { %v1422_v49 = vld [vmem:[%s2092_s3 + $0x110] ss:$8 sps:$4 sm:$0xff]  }
  0xb1   : > { %v281_v51 = vpop.xlane.xlu0 %280  ;;  %1371 = vmatpush3.bf16.msra.mxu0 %v310_v50  ;;  %v284_v52 = vpop.xlane.xlu1 %283  ;;  %v1427_v50 = vld [vmem:[%s2092_s3 + $0x24] ss:$8 sps:$4 sm:$0xff]  }
  0xb2   : > { %1372 = vmatprep.subr.bf16.mxu0 %v1565_v30  ;;  %v295_v53 = vmul.f32 0.00390625, %v281_v51  ;;  %v296_v54 = vmul.f32 0.00390625, %v284_v52  ;;  %v1430_v51 = vld [vmem:[%s2092_s3 + $0x124] ss:$8 sps:$4 sm:$0xff]   ;;  %v1425_v52 = vld [vmem:[%s2092_s3 + $0x20] ss:$8 sps:$4 sm:$0xff]  }
  0xb5   : > { %v257_v55 = vpop.xlane.xlu0 %256  ;;  %v260_v56 = vpop.xlane.xlu1 %259 }
  0xb6   : > { %v304_v57 = vsel %vm299_vm1, %v257_v55, %v295_v53  ;;  %v305_v58 = vsel %vm299_vm1, %v260_v56, %v296_v54  ;;  %v1428_v53 = vld [vmem:[%s2092_s3 + $0x120] ss:$8 sps:$4 sm:$0xff]   ;;  %v1433_v54 = vld [vmem:[%s2092_s3 + $0x34] ss:$8 sps:$4 sm:$0xff]   ;;  %v1431_v56 = vld [vmem:[%s2092_s3 + $0x30] ss:$8 sps:$4 sm:$0xff]  }
  0xb7   : > { %v311_v59 = vpack.c.bf16 %v305_v58, %v304_v57  ;;  %v1436_v55 = vld [vmem:[%s2092_s3 + $0x134] ss:$8 sps:$4 sm:$0xff]   ;;  %v1434_v57 = vld [vmem:[%s2092_s3 + $0x130] ss:$8 sps:$4 sm:$0xff]   ;;  %v1439_v58 = vld [vmem:[%s2092_s3 + $0x44] ss:$8 sps:$4 sm:$0xff]  }
  0xb9   : > { %v287_v60 = vpop.xlane.xlu0 %286  ;;  %1373 = vmatpush3.bf16.msra.mxu0 %v311_v59  ;;  %v290_v61 = vpop.xlane.xlu1 %289  ;;  %v1442_v59 = vld [vmem:[%s2092_s3 + $0x144] ss:$8 sps:$4 sm:$0xff]  }
  0xba   : > { %1374 = vmatprep.subr.bf16.mxu0 %v1565_v30  ;;  %v297_v62 = vmul.f32 0.00390625, %v287_v60  ;;  %v298_v63 = vmul.f32 0.00390625, %v290_v61  ;;  %v1410_v30 = vld [vmem:[%s2091_s2 + $0x8] sm:$0xff]  }
  0xbb   : > { %v1437_v60 = vld [vmem:[%s2092_s3 + $0x40] ss:$8 sps:$4 sm:$0xff]  }
  0xbc   : > { %v1440_v61 = vld [vmem:[%s2092_s3 + $0x140] ss:$8 sps:$4 sm:$0xff]  }
  0xbd   : > { %v263_v3 = vpop.xlane.xlu0 %262  ;;  %v266_v4 = vpop.xlane.xlu1 %265 }
  0xbe   : > { %v306_v6 = vsel %vm299_vm1, %v263_v3, %v297_v62  ;;  %v307_v7 = vsel %vm299_vm1, %v266_v4, %v298_v63  ;;  %v1445_v62 = vld [vmem:[%s2092_s3 + $0x54] ss:$8 sps:$4 sm:$0xff]   ;;  %v1443_v3 = vld [vmem:[%s2092_s3 + $0x50] ss:$8 sps:$4 sm:$0xff]  }
  0xbf   : > { %v312_v12 = vpack.c.bf16 %v307_v7, %v306_v6  ;;  %v1448_v63 = vld [vmem:[%s2092_s3 + $0x154] ss:$8 sps:$4 sm:$0xff]   ;;  %v1446_v4 = vld [vmem:[%s2092_s3 + $0x150] ss:$8 sps:$4 sm:$0xff]   ;;  %v1451_v6 = vld [vmem:[%s2092_s3 + $0x64] ss:$8 sps:$4 sm:$0xff]  }
  0xc0   : > { %v1454_v7 = vld [vmem:[%s2092_s3 + $0x164] ss:$8 sps:$4 sm:$0xff]  }
  0xc1   : > { %1375 = vmatpush3.bf16.msra.mxu0 %v312_v12  ;;  %v1449_v12 = vld [vmem:[%s2092_s3 + $0x60] ss:$8 sps:$4 sm:$0xff]  }
  0xc2   : > { %1057 = vmatprep.subr.bf16.mxu0 %v1415_v43 }
  0xc4   : > { %1377 = vmatmul.mubr.msk.bf16.vlgmr.msra.gmra.mrb[0].mxu0 %vm313_vm2, %v308_v13  ;;  %v1452_v13 = vld [vmem:[%s2092_s3 + $0x160] ss:$8 sps:$4 sm:$0xff]  }
  0xc5   : > { %1058 = vmatpush1.bf16.msra.mxu0 %v1413_v42 }
  0xc6   : > { %1059 = vmatprep.subr.bf16.mxu0 %v1421_v46 }
  0xc9   : > { %1060 = vmatpush1.bf16.msra.mxu0 %v1419_v48 }
  0xca   : > { %1061 = vmatprep.subr.bf16.mxu0 %v1427_v50 }
  0xcd   : > { %1062 = vmatpush1.bf16.msra.mxu0 %v1425_v52 }
  0xce   : > { %1063 = vmatprep.subr.bf16.mxu0 %v1433_v54 }
  0xd1   : > { %1064 = vmatpush1.bf16.msra.mxu0 %v1431_v56 }
  0xd2   : > { %1065 = vmatprep.subr.bf16.mxu0 %v1439_v58 }
  0xd5   : > { %1066 = vmatpush1.bf16.msra.mxu0 %v1437_v60  ;;  %v1455_v60 = vld [vmem:[%s2092_s3 + $0x70] ss:$8 sps:$4 sm:$0xff]  }
  0xd6   : > { %1067 = vmatprep.subr.bf16.mxu0 %v1445_v62 }
  0xd9   : > { %1068 = vmatpush1.bf16.msra.mxu0 %v1443_v3  ;;  %v1458_v3 = vld [vmem:[%s2092_s3 + $0x170] ss:$8 sps:$4 sm:$0xff]  }
  0xda   : > { %1069 = vmatprep.subr.bf16.mxu0 %v1451_v6 }
  0xdd   : > { %1070 = vmatpush1.bf16.msra.mxu0 %v1449_v12  ;;  %v1463_v12 = vld [vmem:[%s2092_s3 + $0x84] ss:$8 sps:$4 sm:$0xff]  }
 0x197   : > { %v351_v19 = vpop.f32.mrb[0].mxu0 }
 0x198   : > { %v357_v20 = vmax.f32 %v351_v19, 0.0  ;;  %v1378_v21 = vpop.f32.mrb[1].mxu0 }
 0x199   : > { %v354_v26 = vpop.f32.mrb[2].mxu0 }
 0x19a   : > { %v366_v27 = vpack.c.bf16 %v357_v20, %v357_v20  ;;  %v1379_v28 = vpop.f32.mrb[3].mxu0 }
 0x19c   : > { %1394 = vmatprep.subr.msk.bf16.mxu1 %vm400_vm4, %v366_v27  ;;  %v402_v29 = vsel %vm400_vm4, %v366_v27, 0 }
 0x19d   : > { %1381 = vmatpush3.bf16.msra.mxu1 %v402_v29 }
 0x19e   : > { %1098 = vmatprep.subr.bf16.mxu1 %v1418_v45 }
 0x1a0   : > { %1383 = vmatmul.mubr.msk.bf16.vlgmr.msra.gmra.mrb[0].mxu1 %vm387_vm3, %v1410_v30 }
 0x1a1   : > { %1386 = vmatprep.mubr.msk.bf16.mxu1 %vm387_vm3, %v1411_v31  ;;  %1099 = vmatpush1.bf16.msra.mxu1 %v1416_v44 }
 0x1a2   : > { %1100 = vmatprep.subr.bf16.mxu1 %v1424_v47 }
 0x1a5   : > { %1101 = vmatpush1.bf16.msra.mxu1 %v1422_v49 }
 0x1a6   : > { %1102 = vmatprep.subr.bf16.mxu1 %v1430_v51 }
 0x1a8   : > { %1387 = vmatmul.mubr.msk.bf16.gmra.mrb[4].mxu1 %vm387_vm3, %v1412_v32 }
 0x1a9   : > { %1103 = vmatpush1.bf16.msra.mxu1 %v1428_v53 }
 0x1aa   : > { %1104 = vmatprep.subr.bf16.mxu1 %v1436_v55 }
 0x1ad   : > { %1105 = vmatpush1.bf16.msra.mxu1 %v1434_v57 }
 0x1ae   : > { %1106 = vmatprep.subr.bf16.mxu1 %v1442_v59 }
 0x1b1   : > { %1107 = vmatpush1.bf16.msra.mxu1 %v1440_v61  ;;  %v1457_v61 = vld [vmem:[%s2092_s3 + $0x74] ss:$8 sps:$4 sm:$0xff]  }
 0x1b2   : > { %1108 = vmatprep.subr.bf16.mxu1 %v1448_v63  ;;  %1071 = vmatprep.subr.bf16.mxu0 %v1457_v61 }
 0x1b3   : > { %1072 = vmatpush1.bf16.msra.mxu0 %v1455_v60 }
 0x1b4   : > { %1073 = vmatprep.subr.bf16.mxu0 %v1463_v12 }
 0x1b5   : > { %1109 = vmatpush1.bf16.msra.mxu1 %v1446_v4  ;;  %v1460_v4 = vld [vmem:[%s2092_s3 + $0x174] ss:$8 sps:$4 sm:$0xff]  }
 0x1b6   : > { %1110 = vmatprep.subr.bf16.mxu1 %v1454_v7 }
 0x1b9   : > { %1111 = vmatpush1.bf16.msra.mxu1 %v1452_v13 }
 0x1ba   : > { %1112 = vmatprep.subr.bf16.mxu1 %v1460_v4 }
 0x1bd   : > { %1113 = vmatpush1.bf16.msra.mxu1 %v1458_v3 }
 0x273   : > { %v1727_v33 = vpop.f32.mrb[0].mxu1 }
 0x274   : > { %481 = vrot.lane.b32.xlu1 %v1727_v33, %s1567_s10  ;;  %v1730_v34 = vpop.f32.mrb[1].mxu1 }
 0x275   : > { %477 = vrot.lane.b32.xlu0 %v1730_v34, %s1567_s10  ;;  %v1733_v35 = vpop.f32.mrb[2].mxu1 }
 0x276   : > { %v1735_v36 = vpop.f32.mrb[3].mxu1 }
 0x278   : > { %479 = vrot.lane.b32.xlu1 %v1735_v36, %s1567_s10 }
 0x27b   : > { %v1738_v37 = vpop.f32.mrb[4].mxu1 }
 0x27c   : > { %483 = vrot.lane.b32.xlu1 %v1733_v35, %s1567_s10  ;;  %v1741_v38 = vpop.f32.mrb[5].mxu1 }
 0x27d   : > { %485 = vrot.lane.b32.xlu0 %v1741_v38, %s1567_s10  ;;  %v1744_v39 = vpop.f32.mrb[6].mxu1 }
 0x27e   : > { %v1746_v40 = vpop.f32.mrb[7].mxu1 }
 0x280   : > { %487 = vrot.lane.b32.xlu1 %v1746_v40, %s1567_s10 }
 0x281   : > { %489 = vrot.lane.b32.xlu0 %v1738_v37, %s1567_s10 }
 0x284   : > { %491 = vrot.lane.b32.xlu1 %v1744_v39, %s1567_s10  ;;  %s2040_s10 = scalar_lea.vmem %s2094_s5, %s1356_s4 }
 0x2e6   : > { %v482_v18 = vpop.permute.xlu1 %481 }
 0x2e7   : > { %v503_v19 = vadd.f32 %v1727_v33, %v482_v18  ;;  %v478_v20 = vpop.permute.xlu0 %477  ;;  %v1461_v18 = vld [vmem:[%s2092_s3 + $0x80] ss:$8 sps:$4 sm:$0xff]  }
 0x2e8   : > { %v501_v21 = vadd.f32 %v478_v20, %v1730_v34  ;;  %v1466_v20 = vld [vmem:[%s2092_s3 + $0x184] ss:$8 sps:$4 sm:$0xff]   ;;  %1074 = vmatpush1.bf16.msra.mxu0 %v1461_v18 }
 0x2e9   : > { %v1282_v26 = vmul.f32 -1.442695, %v503_v19  ;;  %v1464_v19 = vld [vmem:[%s2092_s3 + $0x180] ss:$8 sps:$4 sm:$0xff]   ;;  %1114 = vmatprep.subr.bf16.mxu1 %v1466_v20 }
 0x2ea   : > { %v1280_v27 = vmul.f32 -1.442695, %v501_v21  ;;  %v480_v28 = vpop.permute.xlu1 %479  ;;  %1115 = vmatpush1.bf16.msra.mxu1 %v1464_v19 }
 0x2eb   : > { %v502_v29 = vadd.f32 %v480_v28, %v1735_v36  ;;  %v1467_v28 = vld [vmem:[%s2092_s3 + $0x90] ss:$8 sps:$4 sm:$0xff]  }
 0x2ec   : > { %1509 = vpow2.f32 %v1280_v27 }
 0x2ed   : > { %v1281_v30 = vmul.f32 -1.442695, %v502_v29  ;;  %1511 = vpow2.f32 %v1282_v26  ;;  %v1469_v26 = vld [vmem:[%s2092_s3 + $0x94] ss:$8 sps:$4 sm:$0xff]  }
 0x2ee   : > { %v484_v31 = vpop.permute.xlu1 %483  ;;  %1075 = vmatprep.subr.bf16.mxu0 %v1469_v26 }
 0x2ef   : > { %1513 = vpow2.f32 %v1281_v30  ;;  %v504_v32 = vadd.f32 %v1733_v35, %v484_v31  ;;  %v486_v41 = vpop.permute.xlu0 %485  ;;  %v1470_v30 = vld [vmem:[%s2092_s3 + $0x190] ss:$8 sps:$4 sm:$0xff]   ;;  %v1472_v31 = vld [vmem:[%s2092_s3 + $0x194] ss:$8 sps:$4 sm:$0xff]   ;;  %1076 = vmatpush1.bf16.msra.mxu0 %v1467_v28 }
 0x2f0   : > { %v505_v42 = vadd.f32 %v486_v41, %v1741_v38  ;;  %1116 = vmatprep.subr.bf16.mxu1 %v1472_v31 }
 0x2f1   : > { %v1283_v43 = vmul.f32 -1.442695, %v504_v32  ;;  %v1475_v32 = vld [vmem:[%s2092_s3 + $0xa4] ss:$8 sps:$4 sm:$0xff]   ;;  %1117 = vmatpush1.bf16.msra.mxu1 %v1470_v30 }
 0x2f2   : > { %v1284_v33 = vmul.f32 -1.442695, %v505_v42  ;;  %v488_v44 = vpop.permute.xlu1 %487  ;;  %v1473_v42 = vld [vmem:[%s2092_s3 + $0xa0] ss:$8 sps:$4 sm:$0xff]   ;;  %1077 = vmatprep.subr.bf16.mxu0 %v1475_v32 }
 0x2f3   : > { %1515 = vpow2.f32 %v1283_v43  ;;  %v506_v34 = vadd.f32 %v488_v44, %v1746_v40  ;;  %v490_v45 = vpop.permute.xlu0 %489  ;;  %v1478_v44 = vld [vmem:[%s2092_s3 + $0x1a4] ss:$8 sps:$4 sm:$0xff]   ;;  %1078 = vmatpush1.bf16.msra.mxu0 %v1473_v42 }
 0x2f4   : > { %1517 = vpow2.f32 %v1284_v33  ;;  %v507_v36 = vadd.f32 %v1738_v37, %v490_v45  ;;  %v1476_v33 = vld [vmem:[%s2092_s3 + $0x1a0] ss:$8 sps:$4 sm:$0xff]   ;;  %1118 = vmatprep.subr.bf16.mxu1 %v1478_v44  ;;  %v1479_v45 = vld [vmem:[%s2092_s3 + $0xb0] ss:$8 sps:$4 sm:$0xff]  }
 0x2f5   : > { %v1285_v46 = vmul.f32 -1.442695, %v506_v34  ;;  %v1481_v34 = vld [vmem:[%s2092_s3 + $0xb4] ss:$8 sps:$4 sm:$0xff]   ;;  %1119 = vmatpush1.bf16.msra.mxu1 %v1476_v33 }
 0x2f6   : > { %v1510_v47 = vpop.eup %1509  ;;  %v1286_v48 = vmul.f32 -1.442695, %v507_v36  ;;  %v492_v49 = vpop.permute.xlu1 %491  ;;  %1079 = vmatprep.subr.bf16.mxu0 %v1481_v34  ;;  %v1484_v36 = vld [vmem:[%s2092_s3 + $0x1b4] ss:$8 sps:$4 sm:$0xff]  }
 0x2f7   : > { %v533_v50 = vadd.f32 1.0, %v1510_v47  ;;  %1519 = vpow2.f32 %v1285_v46  ;;  %v508_v35 = vadd.f32 %v1744_v39, %v492_v49  ;;  %v1512_v51 = vpop.eup %1511  ;;  %v1482_v46 = vld [vmem:[%s2092_s3 + $0x1b0] ss:$8 sps:$4 sm:$0xff]   ;;  %1080 = vmatpush1.bf16.msra.mxu0 %v1479_v45  ;;  %1120 = vmatprep.subr.bf16.mxu1 %v1484_v36  ;;  %v1487_v47 = vld [vmem:[%s2092_s3 + $0xc4] ss:$8 sps:$4 sm:$0xff]  }
 0x2f8   : > { %v535_v54 = vadd.f32 1.0, %v1512_v51  ;;  %1081 = vmatprep.subr.bf16.mxu0 %v1487_v47  ;;  %v1490_v49 = vld [vmem:[%s2092_s3 + $0x1c4] ss:$8 sps:$4 sm:$0xff]   ;;  %v1491_v51 = vld [vmem:[%s2092_s3 + $0xd0] ss:$8 sps:$4 sm:$0xff]  }
 0x2f9   : > { %v1514_v38 = vpop.eup %1513  ;;  %1521 = vrcp.f32 %v533_v50  ;;  %v1287_v52 = vmul.f32 -1.442695, %v508_v35  ;;  %1121 = vmatpush1.bf16.msra.mxu1 %v1482_v46  ;;  %v1488_v50 = vld [vmem:[%s2092_s3 + $0x1c0] ss:$8 sps:$4 sm:$0xff]   ;;  %v1493_v35 = vld [vmem:[%s2092_s3 + $0xd4] ss:$8 sps:$4 sm:$0xff]  }
 0x2fa   : > { %v534_v53 = vadd.f32 1.0, %v1514_v38  ;;  %1523 = vpow2.f32 %v1286_v48  ;;  %v1485_v48 = vld [vmem:[%s2092_s3 + $0xc0] ss:$8 sps:$4 sm:$0xff]   ;;  %1122 = vmatprep.subr.bf16.mxu1 %v1490_v49  ;;  %v1496_v38 = vld [vmem:[%s2092_s3 + $0x1d4] ss:$8 sps:$4 sm:$0xff]  }
 0x2fb   : > { %1525 = vpow2.f32 %v1287_v52  ;;  %1082 = vmatpush1.bf16.msra.mxu0 %v1485_v48  ;;  %v1494_v52 = vld [vmem:[%s2092_s3 + $0x1d0] ss:$8 sps:$4 sm:$0xff]  }
 0x2fc   : > { %1527 = vrcp.f32 %v534_v53  ;;  %1083 = vmatprep.subr.bf16.mxu0 %v1493_v35  ;;  %v1499_v53 = vld [vmem:[%s2092_s3 + $0xe4] ss:$8 sps:$4 sm:$0xff]  }
 0x2fd   : > { %v1516_v40 = vpop.eup %1515  ;;  %1529 = vrcp.f32 %v535_v54  ;;  %1123 = vmatpush1.bf16.msra.mxu1 %v1488_v50  ;;  %v1497_v54 = vld [vmem:[%s2092_s3 + $0xe0] ss:$8 sps:$4 sm:$0xff]  }
 0x2fe   : > { %v1518_v55 = vpop.eup %1517  ;;  %v536_v37 = vadd.f32 1.0, %v1516_v40  ;;  %1124 = vmatprep.subr.bf16.mxu1 %v1496_v38  ;;  %v1500_v40 = vld [vmem:[%s2092_s3 + $0x1e0] ss:$8 sps:$4 sm:$0xff]  }
 0x2ff   : > { %v537_v56 = vadd.f32 1.0, %v1518_v55  ;;  %1084 = vmatpush1.bf16.msra.mxu0 %v1491_v51  ;;  %v1502_v55 = vld [vmem:[%s2092_s3 + $0x1e4] ss:$8 sps:$4 sm:$0xff]  }
 0x300   : > { %1531 = vrcp.f32 %v536_v37  ;;  %1085 = vmatprep.subr.bf16.mxu0 %v1499_v53  ;;  %v1505_v37 = vld [vmem:[%s2092_s3 + $0xf4] ss:$8 sps:$4 sm:$0xff]  }
 0x301   : > { %v1520_v57 = vpop.eup %1519  ;;  %1533 = vrcp.f32 %v537_v56  ;;  %1125 = vmatpush1.bf16.msra.mxu1 %v1494_v52  ;;  %v1508_v56 = vld [vmem:[%s2092_s3 + $0x1f4] ss:$8 sps:$4 sm:$0xff]  }
 0x302   : > { %v538_v58 = vadd.f32 1.0, %v1520_v57  ;;  %1126 = vmatprep.subr.bf16.mxu1 %v1502_v55  ;;  %v1503_v57 = vld [vmem:[%s2092_s3 + $0xf0] ss:$8 sps:$4 sm:$0xff]  }
 0x303   : > { %v1522_v59 = vpop.eup %1521  ;;  %1086 = vmatpush1.bf16.msra.mxu0 %v1497_v54 }
 0x304   : > { %v1524_v39 = vpop.eup %1523  ;;  %1535 = vrcp.f32 %v538_v58  ;;  %559 = vperm.xlu0 %1407, %v1522_v59   ;;  %1087 = vmatprep.subr.bf16.mxu0 %v1505_v37  ;;  %v1506_v58 = vld [vmem:[%s2092_s3 + $0x1f0] ss:$8 sps:$4 sm:$0xff]  }
 0x305   : > { %v1526_v62 = vpop.eup %1525  ;;  %v539_v63 = vadd.f32 1.0, %v1524_v39  ;;  %1127 = vmatpush1.bf16.msra.mxu1 %v1500_v40 }
 0x306   : > { %v1528_v6 = vpop.eup %1527  ;;  %v540_v7 = vadd.f32 1.0, %v1526_v62  ;;  %1128 = vmatprep.subr.bf16.mxu1 %v1508_v56 }
 0x307   : > { %1537 = vrcp.f32 %v539_v63  ;;  %564 = vperm.xlu1 %1408, %v1528_v6   ;;  %v1530_v13 = vpop.eup %1529  ;;  %1088 = vmatpush1.bf16.msra.mxu0 %v1503_v57 }
 0x308   : > { %1539 = vrcp.f32 %v540_v7 }
 0x309   : > { %1129 = vmatpush1.bf16.msra.mxu1 %v1506_v58 }
 0x30a   : > { %v1532_v21 = vpop.eup %1531 }
 0x30b   : > { %574 = vperm.xlu0 %1407, %v1532_v21   ;;  %569 = vperm.xlu1 %1408, %v1530_v13   ;;  %v1534_v27 = vpop.eup %1533 }
 0x30e   : > { %v1536_v29 = vpop.eup %1535 }
 0x30f   : > { %579 = vperm.xlu1 %1408, %v1534_v27   ;;  %584 = vperm.xlu0 %1407, %v1536_v29  }
 0x311   : > { %v1538_v41 = vpop.eup %1537 }
 0x312   : > { %v1540_v43 = vpop.eup %1539 }
 0x313   : > { %589 = vperm.xlu1 %1408, %v1538_v41   ;;  %594 = vperm.xlu0 %1407, %v1540_v43  }
 0x383   : > { %v560_v59 = vpop.permute.xlu0 %559 }
 0x384   : > { %v1958_v62 = vmul.f32 %v560_v59, %v1621_v0  ;;  %v1961_v63 = vmul.f32 %v560_v59, %v1624_v1 }
 0x386   : > { %v565_v39 = vpop.permute.xlu1 %564 }
 0x387   : > { %v1952_v60 = vmul.f32 %v565_v39, %v1627_v2  ;;  %v1955_v61 = vmul.f32 %v565_v39, %v1634_v5 }
 0x389   : > { %v639_v0 = vadd.f32 %v1952_v60, %v1958_v62  ;;  %v652_v1 = vadd.f32 %v1955_v61, %v1961_v63 }
 0x38a   : > { %v575_v3 = vpop.permute.xlu0 %574  ;;  %v570_v4 = vpop.permute.xlu1 %569 }
 0x38b   : > { %v1964_v6 = vmul.f32 %v575_v3, %v1647_v10  ;;  %v1967_v7 = vmul.f32 %v575_v3, %v1650_v11  ;;  %v1970_v2 = vmul.f32 %v570_v4, %v1641_v8  ;;  %v1973_v5 = vmul.f32 %v570_v4, %v1644_v9 }
 0x38d   : > { %v614_v12 = vmax.f32 %v1952_v60, %v1964_v6  ;;  %v627_v13 = vmax.f32 %v1955_v61, %v1967_v7  ;;  %v640_v11 = vadd.f32 %v639_v0, %v1970_v2  ;;  %v653_v18 = vadd.f32 %v652_v1, %v1973_v5 }
 0x38e   : > { %v585_v19 = vpop.permute.xlu0 %584  ;;  %v580_v20 = vpop.permute.xlu1 %579  ;;  %v613_v28 = vmax.f32 %v1958_v62, %v1970_v2  ;;  %v626_v29 = vmax.f32 %v1961_v63, %v1973_v5 }
 0x38f   : > { %v1986_v9 = vmul.f32 %v585_v19, %v1663_v16  ;;  %v1989_v21 = vmul.f32 %v585_v19, %v1666_v17  ;;  %v1992_v26 = vmul.f32 %v580_v20, %v1657_v14  ;;  %v1995_v27 = vmul.f32 %v580_v20, %v1660_v15 }
 0x390   : > { %v641_v30 = vadd.f32 %v640_v11, %v1964_v6  ;;  %v654_v31 = vadd.f32 %v653_v18, %v1967_v7 }
 0x391   : > { %v616_v32 = vmax.f32 %v614_v12, %v1986_v9  ;;  %v629_v17 = vmax.f32 %v627_v13, %v1989_v21  ;;  %v615_v41 = vmax.f32 %v613_v28, %v1992_v26  ;;  %v628_v42 = vmax.f32 %v626_v29, %v1995_v27 }
 0x392   : > { %v642_v15 = vadd.f32 %v641_v30, %v1992_v26  ;;  %v655_v43 = vadd.f32 %v654_v31, %v1995_v27  ;;  %v595_v33 = vpop.permute.xlu0 %594  ;;  %v590_v44 = vpop.permute.xlu1 %589 }
 0x393   : > { %v2010_v34 = vmul.f32 %v595_v33, %v1683_v24  ;;  %v2013_v45 = vmul.f32 %v595_v33, %v1686_v25  ;;  %v2016_v36 = vmul.f32 %v590_v44, %v1677_v22  ;;  %v2019_v46 = vmul.f32 %v590_v44, %v1680_v23 }
 0x394   : > { %v643_v47 = vadd.f32 %v642_v15, %v1986_v9  ;;  %v656_v48 = vadd.f32 %v655_v43, %v1989_v21 }
 0x395   : > { %v618_v49 = vmax.f32 %v616_v32, %v2010_v34  ;;  %v631_v50 = vmax.f32 %v629_v17, %v2013_v45  ;;  %v617_v35 = vmax.f32 %v615_v41, %v2016_v36  ;;  %v630_v51 = vmax.f32 %v628_v42, %v2019_v46 }
 0x396   : > { %v644_v38 = vadd.f32 %v643_v47, %v2016_v36  ;;  %v657_v52 = vadd.f32 %v656_v48, %v2019_v46 }
 0x397   : > { %v619_v53 = vmax.f32 %v617_v35, %v618_v49  ;;  %v632_v54 = vmax.f32 %v630_v51, %v631_v50  ;;  %v736_v49 = vstv %s735_s7 }
 0x398   : > { %v645_v40 = vadd.f32 %v644_v38, %v2010_v34  ;;  %v658_v55 = vadd.f32 %v657_v52, %v2013_v45 }
 0x399   : > { %v620_v37 = vrot.slane %v619_v53, 4  ;;  %v633_v56 = vrot.slane %v632_v54, 4 }
 0x39a   : > { %v646_v57 = vrot.slane %v645_v40, 4  ;;  %v659_v58 = vrot.slane %v658_v55, 4 }
 0x39b   : > { %v621_v59 = vmax.f32 %v619_v53, %v620_v37  ;;  %v634_v39 = vmax.f32 %v632_v54, %v633_v56 }
 0x39c   : > { %v647_v3 = vadd.f32 %v646_v57, %v645_v40  ;;  %v660_v4 = vadd.f32 %v659_v58, %v658_v55 }
 0x39d   : > { %v622_v0 = vrot.slane %v621_v59, 2  ;;  %v635_v1 = vrot.slane %v634_v39, 2 }
 0x39e   : > { %v648_v12 = vrot.slane %v647_v3, 2  ;;  %v661_v13 = vrot.slane %v660_v4, 2 }
 0x39f   : > { %v636_v11 = vmax.f32 %v634_v39, %v635_v1  ;;  %v623_v18 = vmax.f32 %v621_v59, %v622_v0  ;;  %v1151_v0 = vlaneseq }
 0x3a0   : > { %v649_v19 = vadd.f32 %v648_v12, %v647_v3  ;;  %v662_v20 = vadd.f32 %v661_v13, %v660_v4 }
 0x3a1   : > { %v637_v28 = vrot.slane %v636_v11, 1  ;;  %v624_v29 = vrot.slane %v623_v18, 1  ;;  %v1152_v12 = vshrl.u32 %v1151_v0, 7 }
 0x3a2   : > { %v650_v30 = vrot.slane %v649_v19, 1  ;;  %v663_v31 = vrot.slane %v662_v20, 1 }
 0x3a3   : > { %v638_v32 = vmax.f32 %v636_v11, %v637_v28  ;;  %v625_v17 = vmax.f32 %v623_v18, %v624_v29  ;;  %v1153_v13 = vsub.s32 0, %v1152_v12 }
 0x3a4   : > { %v664_v41 = vadd.f32 %v663_v31, %v662_v20  ;;  %v651_v42 = vadd.f32 %v650_v30, %v649_v19 }
 0x3a5   : > { %v668_v15 = vpack.c.bf16 %v638_v32, %v638_v32  ;;  %v667_v43 = vpack.c.bf16 %v625_v17, %v625_v17 }
 0x3a6   : > { %v666_v33 = vmul.f32 0.015625, %v664_v41  ;;  %v665_v44 = vmul.f32 0.015625, %v651_v42  ;;  %v1550_v41 = vld [vmem:[%s1618_s24 + $0x10] sm:$0xff] }
 0x3a7   : > { %1089 = vmatprep.mubr.bf16.mxu0 %v668_v15 }
 0x3a8   : > { %1090 = vmatmul.mubr.bf16.vlgmr.msra.gmra.mrb[4].mxu0 %v667_v43  ;;  %v670_v47 = vpack.c.bf16 %v666_v33, %v666_v33  ;;  %v669_v48 = vpack.c.bf16 %v665_v44, %v665_v44 }
 0x3aa   : > { %1130 = vmatprep.mubr.bf16.mxu1 %v670_v47  ;;  %v1553_v47 = vld [vmem:[%s1618_s24 + $0x28] sm:$0xff] }
 0x3ab   : > { %1131 = vmatmul.mubr.bf16.vlgmr.msra.gmra.mrb[8].mxu1 %v669_v48 }
 0x47b   : > { %v1091_v50 = vpop.f32.mrb[4].mxu0 }
 0x47c   : > { %v1092_v35 = vadd.f32 %v1091_v50, %v736_v49  ;;  %v1093_v51 = vpop.f32.mrb[5].mxu0  ;;  %v1556_v50 = vld [vmem:[%s1618_s24 + $0x58] sm:$0xff] }
 0x47d   : > { %v1094_v38 = vadd.f32 %v1093_v51, %v736_v49  ;;  %v1095_v52 = vpop.f32.mrb[6].mxu0  ;;  %v1555_v49 = vld [vmem:[%s1618_s24 + $0x48] sm:$0xff] }
 0x47e   : > { %v1132_v53 = vpop.f32.mrb[8].mxu1  ;;  %v1096_v54 = vpop.f32.mrb[7].mxu0 }
 0x47f   : > { %v1133_v40 = vadd.f32 %v1132_v53, %v1092_v35  ;;  %v1134_v55 = vpop.f32.mrb[9].mxu1 }
 0x480   : > { %v1135_v37 = vadd.f32 %v1134_v55, %v1094_v38  ;;  %v1136_v56 = vpop.f32.mrb[10].mxu1 }
 0x481   : > { %v1352_v57 = vmul.f32 -1.442695, %v1133_v40  ;;  %v1137_v58 = vpop.f32.mrb[11].mxu1 }
 0x482   : > { %v1353_v59 = vmul.f32 -1.442695, %v1135_v37 }
 0x483   : > { %1541 = vpow2.f32 %v1352_v57 }
 0x484   : > { %1543 = vpow2.f32 %v1353_v59 }
 0x48d   : > { %v1542_v39 = vpop.eup %1541 }
 0x48e   : > { %v1544_v3 = vpop.eup %1543  ;;  %v1145_v4 = vadd.f32 1.0, %v1542_v39 }
 0x48f   : > { %v1146_v1 = vadd.f32 1.0, %v1544_v3 }
 0x490   : > { %1545 = vrcp.f32 %v1145_v4 }
 0x491   : > { %1547 = vrcp.f32 %v1146_v1 }
 0x49a   : > { %v1546_v11 = vpop.eup %1545 }
 0x49b   : > { %v1548_v18 = vpop.eup %1547  ;;  %v1154_v19 = vrot.slane %v1546_v11, %v1153_v13 }
 0x49c   : > { %v1158_v20 = vrot.slane %v1548_v18, %v1153_v13 }
 0x49d   : > { %v1159_v28 = vmul.f32 %v1154_v19, %v1958_v62  ;;  %v1161_v29 = vmul.f32 %v1154_v19, %v1952_v60  ;;  %v1163_v30 = vmul.f32 %v1154_v19, %v1970_v2  ;;  %v1165_v31 = vmul.f32 %v1154_v19, %v1964_v6  ;;  %v1549_v2 = vld [vmem:[%s1618_s24] sm:$0xff] }
 0x49e   : > { %v1167_v32 = vmul.f32 %v1154_v19, %v1992_v26  ;;  %v1169_v17 = vmul.f32 %v1154_v19, %v1986_v9  ;;  %v1171_v60 = vmul.f32 %v1154_v19, %v2016_v36  ;;  %v1173_v62 = vmul.f32 %v1154_v19, %v2010_v34 }
 0x49f   : > { %v1175_v6 = vadd.f32 %v1549_v2, %v1159_v28  ;;  %v1177_v42 = vadd.f32 %v1550_v41, %v1161_v29  ;;  %v1179_v15 = vadd.f32 %v1163_v30, %v1641_v8  ;;  %v1181_v43 = vadd.f32 %v1165_v31, %v1647_v10 }
 0x4a0   : > { %v1183_v26 = vadd.f32 %v1167_v32, %v1657_v14  ;;  %v1185_v9 = vadd.f32 %v1169_v17, %v1663_v16  ;;  %v1187_v36 = vadd.f32 %v1171_v60, %v1677_v22  ;;  %v1189_v34 = vadd.f32 %v1173_v62, %v1683_v24 }
 0x4a1   : > { %1191 = vst [vmem:[%s2040_s10] sm:$0xff] %v1175_v6  ;;  %1193 = vst [vmem:[%s2040_s10 + $0x10] sm:$0xff] %v1177_v42  ;;  %v1160_v8 = vmul.f32 %v1158_v20, %v1961_v63  ;;  %v1162_v10 = vmul.f32 %v1158_v20, %v1955_v61  ;;  %v1164_v33 = vmul.f32 %v1158_v20, %v1973_v5  ;;  %v1551_v63 = vld [vmem:[%s1618_s24 + $0x8] sm:$0xff] }
 0x4a2   : > { %1195 = vst [vmem:[%s2040_s10 + $0x20] sm:$0xff] %v1179_v15  ;;  %1197 = vst [vmem:[%s2040_s10 + $0x30] sm:$0xff] %v1181_v43  ;;  %v1166_v14 = vmul.f32 %v1158_v20, %v1967_v7  ;;  %v1168_v16 = vmul.f32 %v1158_v20, %v1995_v27  ;;  %v1170_v22 = vmul.f32 %v1158_v20, %v1989_v21  ;;  %v1552_v7 = vld [vmem:[%s1618_s24 + $0x18] sm:$0xff] }
 0x4a3   : > { %1199 = vst [vmem:[%s2040_s10 + $0x40] sm:$0xff] %v1183_v26  ;;  %1201 = vst [vmem:[%s2040_s10 + $0x50] sm:$0xff] %v1185_v9  ;;  %v1172_v24 = vmul.f32 %v1158_v20, %v2019_v46  ;;  %v1174_v61 = vmul.f32 %v1158_v20, %v2013_v45  ;;  %v1176_v5 = vadd.f32 %v1551_v63, %v1160_v8  ;;  %v1554_v27 = vld [vmem:[%s1618_s24 + $0x38] sm:$0xff] }
 0x4a4   : > { %1203 = vst [vmem:[%s2040_s10 + $0x60] sm:$0xff] %v1187_v36  ;;  %1205 = vst [vmem:[%s2040_s10 + $0x70] sm:$0xff] %v1189_v34  ;;  %v1178_v44 = vadd.f32 %v1552_v7, %v1162_v10  ;;  %v1180_v48 = vadd.f32 %v1553_v47, %v1164_v33  ;;  %v1182_v21 = vadd.f32 %v1554_v27, %v1166_v14 }
 0x4a5   : > { %v1184_v46 = vadd.f32 %v1555_v49, %v1168_v16  ;;  %v1186_v35 = vadd.f32 %v1556_v50, %v1170_v22  ;;  %v1188_v45 = vadd.f32 %v1172_v24, %v1680_v23  ;;  %v1190_v51 = vadd.f32 %v1174_v61, %v1686_v25  ;;  %1192 = vst [vmem:[%s2040_s10 + $0x8] sm:$0xff] %v1176_v5 }
 0x4a6   : > { %1194 = vst [vmem:[%s2040_s10 + $0x18] sm:$0xff] %v1178_v44  ;;  %1196 = vst [vmem:[%s2040_s10 + $0x28] sm:$0xff] %v1180_v48 }
 0x4a7   : > { %1198 = vst [vmem:[%s2040_s10 + $0x38] sm:$0xff] %v1182_v21  ;;  %1200 = vst [vmem:[%s2040_s10 + $0x48] sm:$0xff] %v1184_v46 }
 0x4a8   : > { %1202 = vst [vmem:[%s2040_s10 + $0x58] sm:$0xff] %v1186_v35  ;;  %1204 = vst [vmem:[%s2040_s10 + $0x68] sm:$0xff] %v1188_v45 }
 0x4a9   : > { %1206 = vst [vmem:[%s2040_s10 + $0x78] sm:$0xff] %v1190_v51 }
 0x4aa PF: > { %s16_s20 = sadd.s32 1, %s1563_s20  }
 0x4ab   : > { %p13_p4 = scmp.ge.s32.totalorder %s16_s20, 4  }
 0x4ad   :  { %15 = sbr.rel (!%p13_p4) target bundleno = 2 (0x2), region = 70 }

</bundles_post_ra>
